<compile_context>
chip_gen: v7x
topology: tpu7x:2x2x1
jax: 0.10.0
libtpu: 0.0.40
codegen_flags: <defaults>
</compile_context>

<pallas_src>
import numpy as np
import jax
import jax.numpy as jnp
from jax.experimental import pallas as pl
from jax.experimental.pallas import tpu as pltpu


def _fused_addmm_kernel(lhs_ref, w_ref, b_ref, out_ref):
    """One grid step: one MXU pass + bias + one full-width store.

    lhs_ref : (BB, L+K) f32  VMEM   [seg_scaled | mlp_input] rows for this block
    w_ref   : (L+K, 12) f32  VMEM   combined [embedding | folded-MLP] weight
    b_ref   : (1, 12)   f32  VMEM   combined bias
    out_ref : (BB, 12)  f32  VMEM   [eb, eb, eb, mlp]
    """
    out_ref[...] = (
        jnp.dot(lhs_ref[...], w_ref[...], preferred_element_type=jnp.float32)
        + b_ref[...]
    ).astype(out_ref.dtype)


def group_addmm_1dbias_embedding_bag(eb_input, eb_offsets, mlp_input,
                                     table, w0, b0, w1, b1, w2, b2):
    """eb_input: (L,) int indices, eb_offsets: (B,) int bag starts,
    mlp_input: (B, K) f32.  Returns (B, 12) f32."""
    L = int(eb_input.shape[0])
    B = int(eb_offsets.shape[0])
    K = int(mlp_input.shape[1])

    f32 = jnp.float32
    hp = jax.lax.Precision.HIGHEST

    # ---- grid-invariant preprocessing (done ONCE, wrapper-side XLA) --------
    idx = eb_input.astype(jnp.int32)
    off = eb_offsets.astype(jnp.int32)

    # gathered embedding rows (L,3)
    tab_g = jnp.take(table.astype(f32), idx, axis=0)

    # bag assignment: bag(j) = #(offsets <= j) - 1
    bag_of_j = jnp.searchsorted(off, jnp.arange(L, dtype=jnp.int32),
                                side="right") - 1                      # (L,)
    ends = jnp.concatenate([off[1:], jnp.array([L], dtype=jnp.int32)])
    counts = (ends - off).astype(f32)                                  # (B,)
    inv = jnp.where(counts > 0, 1.0 / jnp.maximum(counts, 1.0), 0.0)   # (B,)

    # pre-scaled segment matrix: eb = seg_scaled @ tab_g  (mean, empty bag->0)
    seg = (bag_of_j[None, :] == jnp.arange(B, dtype=jnp.int32)[:, None])
    seg_scaled = seg.astype(f32) * inv[:, None]                        # (B,L)

    # fold the activation-free 3-layer MLP into one affine map (exact algebra)
    w_fold = jnp.dot(jnp.dot(w0, w1, precision=hp), w2, precision=hp)  # (K,3)
    b_fold = (jnp.dot(jnp.dot(b0, w1, precision=hp) + b1, w2, precision=hp)
              + b2)                                                    # (3,)

    # combined LHS / weight / bias so [eb, eb, eb, mlp] is ONE matmul
    lhs = jnp.concatenate([seg_scaled, mlp_input.astype(f32)], axis=1)  # (B,L+K)
    w_top = jnp.concatenate([tab_g, tab_g, tab_g,
                             jnp.zeros((L, 3), f32)], axis=1)           # (L,12)
    w_bot = jnp.concatenate([jnp.zeros((K, 9), f32), w_fold], axis=1)   # (K,12)
    w_comb = jnp.concatenate([w_top, w_bot], axis=0)                    # (L+K,12)
    b_comb = jnp.concatenate([jnp.zeros((9,), f32),
                              b_fold.astype(f32)]).reshape(1, 12)       # (1,12)

    # ---- block/grid selection ----------------------------------------------
    # Small B -> single full block (block_shape == array dims is always legal).
    # Large B -> 512-row blocks (cheap in VMEM, amortizes per-step overhead,
    # and yields >=2 "parallel" grid steps so v7x can use both TensorCores).
    max_block = 512
    if B <= max_block:
        block_b = B
        b_pad = B
    else:
        block_b = max_block
        b_pad = -(-B // block_b) * block_b
        if b_pad != B:
            lhs = jnp.pad(lhs, ((0, b_pad - B), (0, 0)))  # pad rows -> bias only
    grid = (b_pad // block_b,)

    out = pl.pallas_call(
        _fused_addmm_kernel,
        out_shape=jax.ShapeDtypeStruct((b_pad, 12), f32),
        grid=grid,
        in_specs=[
            pl.BlockSpec((block_b, L + K), lambda i: (i, 0)),   # lhs rows
            pl.BlockSpec((L + K, 12), lambda i: (0, 0)),        # combined W
            pl.BlockSpec((1, 12), lambda i: (0, 0)),            # combined b
        ],
        out_specs=pl.BlockSpec((block_b, 12), lambda i: (i, 0)),
        compiler_params=pltpu.CompilerParams(
            dimension_semantics=("parallel",)),
    )(lhs, w_comb, b_comb)

    if b_pad != B:
        out = out[:B]
    return out


def _reference(eb_input, eb_offsets, mlp_input, table, w0, b0, w1, b1, w2, b2):
    """Pure-numpy reference mimicking the PyTorch module (chained MLP)."""
    idx = np.asarray(eb_input)
    off = np.asarray(eb_offsets)
    tab = np.asarray(table, dtype=np.float32)
    x = np.asarray(mlp_input, dtype=np.float32)
    L = idx.shape[0]
    ends = np.append(off[1:], L)
    gathered = tab[idx]                                         # (L,3)
    bags = []
    for s, e in zip(off, ends):
        if e > s:
            bags.append(gathered[s:e].mean(axis=0))
        else:
            bags.append(np.zeros(3, dtype=np.float32))
    eb = np.stack(bags, axis=0)                                 # (B,3)
    h = x @ np.asarray(w0) + np.asarray(b0)
    h = h @ np.asarray(w1) + np.asarray(b1)
    h = h @ np.asarray(w2) + np.asarray(b2)
    return np.concatenate([eb, eb, eb, h], axis=1).astype(np.float32)


if __name__ == "__main__":
    key = jax.random.PRNGKey(0)
    k_idx, k_x, k_tab, k0, kb0, k1, kb1, k2, kb2 = jax.random.split(key, 9)

    num_embeddings = 32
    K = 16          # mlp input feature dim ("k" in the module)
    B = 4           # number of bags == mlp batch
    L = 8           # total number of embedding indices

    eb_input = jax.random.randint(k_idx, (L,), 0, num_embeddings, dtype=jnp.int32)
    # includes an empty bag (bag 1) and uneven bag sizes
    eb_offsets = jnp.array([0, 2, 2, 5], dtype=jnp.int32)
    mlp_input = jax.random.normal(k_x, (B, K), dtype=jnp.float32)

    # parameters (deterministic init; weights stored as (in, out))
    table = jax.random.normal(k_tab, (num_embeddings, 3), dtype=jnp.float32)
    w0 = jax.random.normal(k0, (K, 12), dtype=jnp.float32) * 0.1
    b0 = jax.random.normal(kb0, (12,), dtype=jnp.float32) * 0.1
    w1 = jax.random.normal(k1, (12, 6), dtype=jnp.float32) * 0.1
    b1 = jax.random.normal(kb1, (6,), dtype=jnp.float32) * 0.1
    w2 = jax.random.normal(k2, (6, 3), dtype=jnp.float32) * 0.1
    b2 = jax.random.normal(kb2, (3,), dtype=jnp.float32) * 0.1

    out = group_addmm_1dbias_embedding_bag(
        eb_input, eb_offsets, mlp_input, table, w0, b0, w1, b1, w2, b2)
    out = jax.block_until_ready(out)

    ref = _reference(eb_input, eb_offsets, mlp_input, table, w0, b0, w1, b1, w2, b2)
    assert out.shape == (B, 12), out.shape
    assert np.allclose(np.asarray(out), ref, atol=1e-5, rtol=1e-5), (out, ref)

    print("KERNEL_OK")
</pallas_src>

<mosaic_0001>
module attributes {stable_mosaic.version = 11 : i64} {
  func.func @_fused_addmm_kernel(%arg0: i32, %arg1: memref<4x24xf32, #tpu.memory_space<vmem>>, %arg2: memref<24x12xf32, #tpu.memory_space<vmem>>, %arg3: memref<1x12xf32, #tpu.memory_space<vmem>>, %arg4: memref<4x12xf32, #tpu.memory_space<vmem>>) attributes {dimension_semantics = [#tpu.dimension_semantics<parallel>], iteration_bounds = array<i64: 1>, scalar_prefetch = 0 : i64, scratch_operands = 0 : i64, tpu.core_type = #tpu.core_type<tc>, window_params = [{transform_indices = @transform_0, window_bounds = array<i64: 4, 24>}, {pipeline_mode = #tpu.pipeline_mode<synchronous>, transform_indices = @transform_1, window_bounds = array<i64: 24, 12>}, {pipeline_mode = #tpu.pipeline_mode<synchronous>, transform_indices = @transform_2, window_bounds = array<i64: 1, 12>}, {transform_indices = @transform_3, window_bounds = array<i64: 4, 12>}]} {
    %c0 = arith.constant 0 : index
    %c0_0 = arith.constant 0 : index
    %0 = vector.load %arg1[%c0, %c0_0] : memref<4x24xf32, #tpu.memory_space<vmem>>, vector<4x24xf32>
    %c0_1 = arith.constant 0 : index
    %c0_2 = arith.constant 0 : index
    %1 = vector.load %arg2[%c0_1, %c0_2] : memref<24x12xf32, #tpu.memory_space<vmem>>, vector<24x12xf32>
    %cst = arith.constant dense<0.000000e+00> : vector<4x12xf32>
    %2 = tpu.matmul %0, %1, %cst {dimension_numbers = #tpu.dot_dimension_numbers<[1], [0], [0], [1], [0, 0, 1, 1], [], []>} : vector<4x24xf32>, vector<24x12xf32>, vector<4x12xf32> -> vector<4x12xf32>
    %c0_3 = arith.constant 0 : index
    %c0_4 = arith.constant 0 : index
    %3 = vector.load %arg3[%c0_3, %c0_4] : memref<1x12xf32, #tpu.memory_space<vmem>>, vector<1x12xf32>
    %4 = vector.broadcast %3 : vector<1x12xf32> to vector<4x12xf32>
    %5 = arith.addf %2, %4 : vector<4x12xf32>
    %c0_5 = arith.constant 0 : index
    %c0_6 = arith.constant 0 : index
    %6 = vector.load %arg4[%c0_5, %c0_6] : memref<4x12xf32, #tpu.memory_space<vmem>>, vector<4x12xf32>
    tpu.vector_store %arg4[%c0_5, %c0_6], %5 {strides = array<i32>} : memref<4x12xf32, #tpu.memory_space<vmem>>, vector<4x12xf32>,
    return
  }
  func.func @transform_0(%arg0: i32) -> (i32, i32) {
    %c0_i32 = arith.constant 0 : i32
    %c0_i32_0 = arith.constant 0 : i32
    return %arg0, %c0_i32 : i32, i32
  }
  func.func @transform_1(%arg0: i32) -> (i32, i32) {
    %c0_i32 = arith.constant 0 : i32
    %c0_i32_0 = arith.constant 0 : i32
    %c0_i32_1 = arith.constant 0 : i32
    return %c0_i32, %c0_i32_0 : i32, i32
  }
  func.func @transform_2(%arg0: i32) -> (i32, i32) {
    %c0_i32 = arith.constant 0 : i32
    %c0_i32_0 = arith.constant 0 : i32
    %c0_i32_1 = arith.constant 0 : i32
    return %c0_i32, %c0_i32_0 : i32, i32
  }
  func.func @transform_3(%arg0: i32) -> (i32, i32) {
    %c0_i32 = arith.constant 0 : i32
    %c0_i32_0 = arith.constant 0 : i32
    return %arg0, %c0_i32 : i32, i32
  }
}

</mosaic_0001>

<bundles_post_ra>
// kernel: tpu_custom_call.1
= control target key start
LH: loop header
LB: loop body
LE: loop exit
PB: predicated region body
PF: predicated region fallthrough
CT: control target
= control target key end

     0   :  { %v162_v2 = vmov 0.0|0.0   ;;  %vm163_vm0 = vmmov 0   ;;  %v164_v4 = vmov 0.0   ;;  %s213_s0 = inlined_call_operand.vmem [shape: f32[4,24], index: 0, kind: input, shape index: {}]   ;;  %s214_s1 = inlined_call_operand.vmem [shape: f32[24,12], index: 1, kind: input, shape index: {}]   ;;  %s215_s2 = inlined_call_operand.vmem [shape: f32[1,12], index: 2, kind: input, shape index: {}]   ;;  %s216_s3 = inlined_call_operand.hbm [shape: f32[4,12], index: 3, kind: output, shape index: {}]  }
   0x1   :  { %v16_v0 = vld [vmem:[%s214_s1] sm:$0xff]  ;;  %v17_v1 = vld [vmem:[%s214_s1 + $0x8] sm:$0xff]  ;;  %131 = vmatprep.subr.bf16.mxu0 %v162_v2  ;;  %128 = vmatprep.mubr.msk.f32.mxu0 %vm163_vm0, %v164_v4 }
   0x2   :  { %v132_v3 = vpack.c.bf16 %v17_v1, %v16_v0 }
   0x3   :  { %8 = vsyncpa [#allocation3], 0  ;;  %v18_v5 = vld [vmem:[%s214_s1 + $0x10] sm:$0xff]  ;;  %v15_v6 = vld [vmem:[%s213_s0] sm:$0xf]  ;;  %vm26_vm1 = vcmask 195584  }
   0x4   :  { %133 = vmatpush3.bf16.msra.mxu0 %v132_v3  ;;  %v116_v7 = vld [vmem:[%s215_s2] ss:$0 sm:$0xff]  ;;  %s165_s22 = smov [#allocation2]   ;;  %vm100_vm2 = vcmask 93184  }
   0x5   :  { %126 = vmatprep.subr.mxu0 %v164_v4  ;;  %s108_s23 = sshll.u32 %s165_s22, 4  ;;  %s109_s23 = int_to_ptr.vmem [resolvable:$true] %s108_s23 }
   0x6   :  { %s138_s1 = scalar_lea.vmem %s109_s23, 64  ;;  %p143_p1 = scmp.lt.s32.totalorder %s109_s23, %s109_s23 }
   0x7   :  { %p139_p0 = scmp.ne.s32.totalorder %s109_s23, %s138_s1  ;;  %p144_p2 = scmp.lt.s32.totalorder %s138_s1, %s138_s1 }
   0x8   :  { %127 = vmatpush3.msra.mxu0 %v18_v5 }
   0x9   :  { %129 = vmatmul.mubr.msk.f32.vlgmr.msra.gmra.mrb[0].mxu0 %vm26_vm1, %v15_v6  ;;  %p145_p3 = por %p144_p2, %p143_p1 }
   0xb   :  { %p146_p4 = pnand %p145_p3, %p139_p0 }
  0xdc   :  { %v96_v8 = vpop.f32.mrb[0].mxu0 }
  0xdd   :  { %v97_v9 = vadd.f32 %v116_v7, %v96_v8  ;;  %v130_v10 = vpop.f32.mrb[1].mxu0 }
  0xdf   :  { %101 = vst.msk [vmem:[#allocation2] sm:$0xf] %vm100_vm2, %v97_v9 }
  0xe0   :  { %149 = shalt.err (!%p146_p4)
}
  0xe1   :  { %s150_s25 = scalar_lea.hbm %s216_s3, 64 }
  0xe2   :  { %p151_p5 = scmp.ne.s32.totalorder %s216_s3, %s150_s25  ;;  %p154_p6 = scmp.lt.u32.totalorder %s150_s25, %s216_s3 }
  0xe4   :  { %p156_p7 = pnand %p154_p6, %p151_p5 }
  0xe6   :  { %159 = shalt.err (!%p156_p7)
}
  0xe7   :  { %111 = dma.vmem_to_hbm [thread:$0]  %s109_s23, 64, %s216_s3, [#allocation3]  }
  0xe8   :  { %160 = dma.done.wait [#allocation3], 64  }
  0xe9   :  { %161 = vsyncadd [#allocation3], 4294967232 }
  0xea   :  { %115 = vsyncpa [#allocation3], 1 }

</bundles_post_ra>
